<compile_context>
chip_gen: v7x
topology: tpu7x:2x2x1
jax: 0.10.0
libtpu: 0.0.40
codegen_flags: <defaults>
</compile_context>

<pallas_src>
import jax
import jax.numpy as jnp
from jax.experimental import pallas as pl
from jax.experimental.pallas import tpu as pltpu


def _critic_kernel(x_ref, w_ref, b_ref, o_ref):
    # x_ref: (TM, D) VMEM, w_ref: (1, D) VMEM, b_ref: (1, 1) SMEM, o_ref: (1, TM) VMEM
    x = x_ref[...]
    w = w_ref[...]
    # (1, D) contracted with (TM, D) on the last dim of both -> (1, TM), f32 accumulation.
    y = jax.lax.dot_general(
        w, x,
        dimension_numbers=(((1,), (1,)), ((), ())),
        preferred_element_type=jnp.float32,
    )
    o_ref[...] = (y + b_ref[0, 0]).astype(o_ref.dtype)


def _choose_tile_rows(m, d):
    """Row tile: multiple of 128 (lane-dense output), ~<=8 MiB per input buffer so the
    double-buffered tile fits comfortably in VMEM on v5e / v6e / v7x."""
    bytes_per_row = max(d * 4, 1)
    rows_by_vmem = (8 * 1024 * 1024) // bytes_per_row
    tm = min(2048, max(128, rows_by_vmem))
    tm = max(128, (tm // 128) * 128)
    m_rounded = ((m + 127) // 128) * 128
    return min(tm, m_rounded)


def self_teach_forward(cot_embedding, weight, bias):
    """cot_embedding: (B, S, D); weight: (1, D); bias: (1,)  ->  (B, S, 1)."""
    B, S, D = cot_embedding.shape
    M = B * S
    TM = _choose_tile_rows(M, D)
    num_tiles = pl.cdiv(M, TM)
    M_pad = num_tiles * TM

    x2d = cot_embedding.reshape(M, D)
    if M_pad != M:
        x2d = jnp.pad(x2d, ((0, M_pad - M), (0, 0)))

    w = weight.reshape(1, D).astype(jnp.float32)   # Linear applies x @ W^T; keep W as (1, D)
    b = bias.reshape(1, 1).astype(jnp.float32)

    cost = pl.CostEstimate(
        flops=2 * M_pad * D,
        transcendentals=0,
        bytes_accessed=4 * (M_pad * D + D + M_pad + 1),
    )

    out = pl.pallas_call(
        _critic_kernel,
        out_shape=jax.ShapeDtypeStruct((1, M_pad), cot_embedding.dtype),
        grid_spec=pltpu.PrefetchScalarGridSpec(
            num_scalar_prefetch=0,
            grid=(num_tiles,),
            in_specs=[
                pl.BlockSpec((TM, D), lambda i: (i, 0)),                 # streamed row tiles
                pl.BlockSpec((1, D), lambda i: (0, 0)),                  # weight, VMEM-resident
                pl.BlockSpec(memory_space=pltpu.MemorySpace.SMEM),       # bias scalar in SMEM
            ],
            out_specs=pl.BlockSpec((1, TM), lambda i: (0, i)),           # lane-dense output slab
        ),
        compiler_params=pltpu.CompilerParams(
            dimension_semantics=("parallel",),        # independent tiles -> v7x dual-TC sharding
            vmem_limit_bytes=64 * 1024 * 1024,        # above v5e/v6e scoped defaults, <= v7x physical
        ),
        cost_estimate=cost,
    )(x2d, w, b)

    return out.reshape(M_pad)[:M].reshape(B, S, 1)


if __name__ == "__main__":
    key = jax.random.PRNGKey(0)
    B, S, D = 2, 8, 32  # batch, seq, embed_dim

    k_x, k_w, k_b = jax.random.split(key, 3)
    cot_embedding = jax.random.normal(k_x, (B, S, D), dtype=jnp.float32)
    # Deterministic parameter init (mimics nn.Linear uniform(-1/sqrt(D), 1/sqrt(D)))
    bound = 1.0 / (D ** 0.5)
    weight = jax.random.uniform(k_w, (1, D), minval=-bound, maxval=bound, dtype=jnp.float32)
    bias = jax.random.uniform(k_b, (1,), minval=-bound, maxval=bound, dtype=jnp.float32)

    reward = self_teach_forward(cot_embedding, weight, bias)
    reward = jax.block_until_ready(reward)

    # sanity check against plain JAX reference
    ref = cot_embedding @ weight.T + bias  # (B, S, 1)
    assert reward.shape == (B, S, 1)
    assert jnp.allclose(reward, ref, atol=1e-5, rtol=1e-5)

    print("KERNEL_OK")
</pallas_src>

<mosaic_0001>
module attributes {stable_mosaic.version = 11 : i64} {
  func.func @_critic_kernel(%arg0: i32, %arg1: memref<128x32xf32, #tpu.memory_space<vmem>>, %arg2: memref<1x32xf32, #tpu.memory_space<vmem>>, %arg3: memref<1x1xf32, #tpu.memory_space<smem>>, %arg4: memref<1x128xf32, #tpu.memory_space<vmem>>) attributes {dimension_semantics = [#tpu.dimension_semantics<parallel>], iteration_bounds = array<i64: 1>, scalar_prefetch = 0 : i64, scratch_operands = 0 : i64, tpu.core_type = #tpu.core_type<tc>, window_params = [{transform_indices = @transform_0, window_bounds = array<i64: 128, 32>}, {pipeline_mode = #tpu.pipeline_mode<synchronous>, transform_indices = @transform_1, window_bounds = array<i64: 1, 32>}, {transform_indices = @transform_2, window_bounds = array<i64: 1, 1>}, {transform_indices = @transform_3, window_bounds = array<i64: 1, 128>}]} {
    %c0 = arith.constant 0 : index
    %c0_0 = arith.constant 0 : index
    %0 = vector.load %arg1[%c0, %c0_0] : memref<128x32xf32, #tpu.memory_space<vmem>>, vector<128x32xf32>
    %c0_1 = arith.constant 0 : index
    %c0_2 = arith.constant 0 : index
    %1 = vector.load %arg2[%c0_1, %c0_2] : memref<1x32xf32, #tpu.memory_space<vmem>>, vector<1x32xf32>
    %cst = arith.constant dense<0.000000e+00> : vector<1x128xf32>
    %2 = tpu.matmul %1, %0, %cst {dimension_numbers = #tpu.dot_dimension_numbers<[1], [1], [0], [0], [0, 0, 1, 0], [], []>} : vector<1x32xf32>, vector<128x32xf32>, vector<1x128xf32> -> vector<1x128xf32>
    %c0_3 = arith.constant 0 : index
    %c0_4 = arith.constant 0 : index
    %3 = memref.load %arg3[%c0_3, %c0_4] : memref<1x1xf32, #tpu.memory_space<smem>>
    %4 = vector.broadcast %3 : f32 to vector<1x128xf32>
    %5 = arith.addf %2, %4 : vector<1x128xf32>
    %c0_5 = arith.constant 0 : index
    %c0_6 = arith.constant 0 : index
    %6 = vector.load %arg4[%c0_5, %c0_6] : memref<1x128xf32, #tpu.memory_space<vmem>>, vector<1x128xf32>
    tpu.vector_store %arg4[%c0_5, %c0_6], %5 {strides = array<i32>} : memref<1x128xf32, #tpu.memory_space<vmem>>, vector<1x128xf32>,
    return
  }
  func.func @transform_0(%arg0: i32) -> (i32, i32) {
    %c0_i32 = arith.constant 0 : i32
    %c0_i32_0 = arith.constant 0 : i32
    return %arg0, %c0_i32 : i32, i32
  }
  func.func @transform_1(%arg0: i32) -> (i32, i32) {
    %c0_i32 = arith.constant 0 : i32
    %c0_i32_0 = arith.constant 0 : i32
    %c0_i32_1 = arith.constant 0 : i32
    return %c0_i32, %c0_i32_0 : i32, i32
  }
  func.func @transform_2(%arg0: i32) -> (i32, i32) {
    %c0_i32 = arith.constant 0 : i32
    %c0_i32_0 = arith.constant 0 : i32
    %c0_i32_1 = arith.constant 0 : i32
    return %c0_i32, %c0_i32_0 : i32, i32
  }
  func.func @transform_3(%arg0: i32) -> (i32, i32) {
    %c0_i32 = arith.constant 0 : i32
    %c0_i32_0 = arith.constant 0 : i32
    return %c0_i32, %arg0 : i32, i32
  }
}

</mosaic_0001>

<bundles_post_ra>
// kernel: tpu_custom_call.1
= control target key start
LH: loop header
LB: loop body
LE: loop exit
PB: predicated region body
PF: predicated region fallthrough
CT: control target
= control target key end

     0   :  { %9 = vsyncpa [#allocation4], 0  ;;  %s471_s0 = inlined_call_operand.hbm [shape: f32[128,32], index: 0, kind: input, shape index: {}]   ;;  %s472_s1 = inlined_call_operand.hbm [shape: f32[1,32], index: 1, kind: input, shape index: {}]   ;;  %s473_s2 = inlined_call_operand.<no memory space> [shape: f32[1,1], index: 2, kind: input, shape index: {}]   ;;  %s474_s3 = inlined_call_operand.hbm [shape: f32[1,128], index: 3, kind: output, shape index: {}]  }
   0x1   :  { %10 = vsyncpa [#allocation7], 0 }
   0x2   :  { %11 = vsyncpa [#allocation5], 0  ;;  %s381_s12 = smov [#allocation3]   ;;  %s309_s16 = scalar_lea.hbm %s471_s0, 2048 }
   0x3   :  { %s17_s13 = sshll.u32 %s381_s12, 4  ;;  %p310_p0 = scmp.ne.s32.totalorder %s471_s0, %s309_s16  ;;  %s18_s13 = int_to_ptr.vmem [resolvable:$true] %s17_s13 }
   0x4   :  { %p313_p1 = scmp.lt.u32.totalorder %s309_s16, %s471_s0 }
   0x6   :  { %p315_p2 = pnand %p313_p1, %p310_p0 }
   0x8   :  { %318 = shalt.err (!%p315_p2)
}
   0x9   :  { %s319_s21 = scalar_lea.vmem %s18_s13, 2048  ;;  %p324_p4 = scmp.lt.s32.totalorder %s18_s13, %s18_s13 }
   0xa   :  { %p320_p3 = scmp.ne.s32.totalorder %s18_s13, %s319_s21  ;;  %p325_p5 = scmp.lt.s32.totalorder %s319_s21, %s319_s21 }
   0xc   :  { %p326_p6 = por %p325_p5, %p324_p4 }
   0xe   :  { %p327_p7 = pnand %p326_p6, %p320_p3 }
  0x10   :  { %330 = shalt.err (!%p327_p7)
}
  0x11   :  { %s382_s22 = smov 128   ;;  %s383_s23 = smov 8  }
  0x12   :  { %23 = dma.hbm_to_vmem [thread:$0]  %s471_s0, 2048, %s18_s13, [#allocation4], %s382_s22, %s382_s22, %s383_s23  }
  0x13   :  { %s384_s26 = smov [#allocation6]   ;;  %s331_s30 = scalar_lea.hbm %s472_s1, 16 }
  0x14   :  { %s30_s27 = sshll.u32 %s384_s26, 4  ;;  %p332_p8 = scmp.ne.s32.totalorder %s472_s1, %s331_s30  ;;  %s31_s27 = int_to_ptr.vmem [resolvable:$true] %s30_s27 }
  0x15   :  { %p335_p9 = scmp.lt.u32.totalorder %s331_s30, %s472_s1 }
  0x17   :  { %p337_p10 = pnand %p335_p9, %p332_p8 }
  0x19   :  { %340 = shalt.err (!%p337_p10)
}
  0x1a   :  { %s341_s8 = scalar_lea.vmem %s31_s27, 16  ;;  %s345_s0 = scalar_lea.vmem %s31_s27, 32 }
  0x1b   :  { %p342_p11 = scmp.ne.s32.totalorder %s31_s27, %s341_s8  ;;  %p346_p12 = scmp.lt.s32.totalorder %s31_s27, %s31_s27 }
  0x1c   :  { %p347_p13 = scmp.lt.s32.totalorder %s345_s0, %s341_s8 }
  0x1e   :  { %p348_p0 = por %p347_p13, %p346_p12 }
  0x20   :  { %p349_p1 = pnand %p348_p0, %p342_p11 }
  0x22   :  { %352 = shalt.err (!%p349_p1)
}
  0x23   :  { %33 = dma.hbm_to_vmem [thread:$0]  %s472_s1, 16, %s31_s27, [#allocation7]  }
  0x24   :  { %375 = dma.done.wait [#allocation4], 2048  }
  0x25   :  { %376 = vsyncadd [#allocation4], 4294965248 }
  0x26   :  { %377 = dma.done.wait [#allocation7], 16  }
  0x27   :  { %378 = vsyncadd [#allocation7], 4294967280  ;;  %v385_v0 = vmov 0.0|0.0   ;;  %vm386_vm0 = vmmov 0   ;;  %v387_v1 = vmov 0.0   ;;  %vm61_vm1 = vcmask 261120  }
  0x28   :  { %269 = vmatprep.subr.bf16.mxu0 %v385_v0  ;;  %266 = vmatprep.mubr.msk.f32.mxu0 %vm386_vm0, %v387_v1  ;;  %v42_v2 = vld [vmem:[#allocation3] sm:$0xff]  ;;  %v43_v3 = vld [vmem:[#allocation3 + $0x8] sm:$0xff]  ;;  %vm435_vm2 = vmpackc.low %vm61_vm1, %vm61_vm1  ;;  %v60_v28 = vstv %s473_s2  ;;  %s388_s12 = smov [#allocation8]  }
  0x29   :  { %v270_v5 = vpack.c.bf16 %v43_v3, %v42_v2  ;;  %v44_v6 = vld [vmem:[#allocation3 + $0x10] sm:$0xff]  ;;  %v45_v7 = vld [vmem:[#allocation3 + $0x18] sm:$0xff]  ;;  %v46_v9 = vld [vmem:[#allocation3 + $0x20] sm:$0xff]  ;;  %s190_s13 = sshll.u32 %s388_s12, 4  ;;  %s191_s13 = int_to_ptr.vmem [resolvable:$true] %s190_s13 }
  0x2a   :  { %v274_v8 = vpack.c.bf16 %v45_v7, %v44_v6  ;;  %v47_v10 = vld [vmem:[#allocation3 + $0x28] sm:$0xff]  ;;  %v48_v12 = vld [vmem:[#allocation3 + $0x30] sm:$0xff]  ;;  %v49_v13 = vld [vmem:[#allocation3 + $0x38] sm:$0xff]  ;;  %s353_s14 = scalar_lea.vmem %s191_s13, 16  ;;  %s357_s15 = scalar_lea.vmem %s191_s13, 32 }
  0x2b   :  { %272 = vmatpush3.bf16.xpose.msk.msra.mxu0 %vm435_vm2, %v270_v5  ;;  %v278_v11 = vpack.c.bf16 %v47_v10, %v46_v9  ;;  %v282_v14 = vpack.c.bf16 %v49_v13, %v48_v12  ;;  %v50_v15 = vld [vmem:[#allocation3 + $0x40] sm:$0xff]  ;;  %v51_v16 = vld [vmem:[#allocation3 + $0x48] sm:$0xff]  ;;  %v52_v18 = vld [vmem:[#allocation3 + $0x50] sm:$0xff]  ;;  %p354_p2 = scmp.ne.s32.totalorder %s191_s13, %s353_s14  ;;  %p358_p3 = scmp.lt.s32.totalorder %s191_s13, %s191_s13 }
  0x2c   :  { %273 = vmatprep.subr.bf16.mxu0 %v385_v0  ;;  %v286_v17 = vpack.c.bf16 %v51_v16, %v50_v15  ;;  %v53_v19 = vld [vmem:[#allocation3 + $0x58] sm:$0xff]  ;;  %v54_v21 = vld [vmem:[#allocation3 + $0x60] sm:$0xff]  ;;  %v55_v22 = vld [vmem:[#allocation3 + $0x68] sm:$0xff]  ;;  %p359_p4 = scmp.lt.s32.totalorder %s357_s15, %s353_s14 }
  0x2d   :  { %v290_v20 = vpack.c.bf16 %v53_v19, %v52_v18  ;;  %v294_v23 = vpack.c.bf16 %v55_v22, %v54_v21  ;;  %v56_v24 = vld [vmem:[#allocation3 + $0x70] sm:$0xff]  ;;  %v57_v25 = vld [vmem:[#allocation3 + $0x78] sm:$0xff]  ;;  %v58_v27 = vld [vmem:[#allocation6] sm:$0x1] }
  0x2e   :  { %v298_v26 = vpack.c.bf16 %v57_v25, %v56_v24  ;;  %p360_p5 = por %p359_p4, %p358_p3 }
  0x30   :  { %p361_p6 = pnand %p360_p5, %p354_p2 }
  0x33   :  { %276 = vmatpush3.bf16.xpose.msk.msra.mxu0 %vm435_vm2, %v274_v8 }
  0x34   :  { %277 = vmatprep.subr.bf16.mxu0 %v385_v0 }
  0x3b   :  { %280 = vmatpush3.bf16.xpose.msk.msra.mxu0 %vm435_vm2, %v278_v11 }
  0x3c   :  { %281 = vmatprep.subr.bf16.mxu0 %v385_v0 }
  0x43   :  { %284 = vmatpush3.bf16.xpose.msk.msra.mxu0 %vm435_vm2, %v282_v14 }
  0x44   :  { %285 = vmatprep.subr.bf16.mxu0 %v385_v0 }
  0x4b   :  { %288 = vmatpush3.bf16.xpose.msk.msra.mxu0 %vm435_vm2, %v286_v17 }
  0x4c   :  { %289 = vmatprep.subr.bf16.mxu0 %v385_v0 }
  0x53   :  { %292 = vmatpush3.bf16.xpose.msk.msra.mxu0 %vm435_vm2, %v290_v20 }
  0x54   :  { %293 = vmatprep.subr.bf16.mxu0 %v385_v0 }
  0x5b   :  { %296 = vmatpush3.bf16.xpose.msk.msra.mxu0 %vm435_vm2, %v294_v23 }
  0x5c   :  { %297 = vmatprep.subr.bf16.mxu0 %v385_v0 }
  0x63   :  { %300 = vmatpush3.bf16.xpose.msk.msra.mxu0 %vm435_vm2, %v298_v26 }
  0x6a   :  { %267 = vmatmul.mubr.msk.f32.vlgmr.msra.gmra.mrb[0].mxu0 %vm61_vm1, %v58_v27 }
 0x13d   :  { %v179_v29 = vpop.f32.mrb[0].mxu0 }
 0x13e   :  { %v180_v30 = vadd.f32 %v179_v29, %v60_v28  ;;  %v268_v31 = vpop.f32.mrb[1].mxu0 }
 0x140   :  { %183 = vst [vmem:[#allocation8] sm:$0x1] %v180_v30 }
 0x141   :  { %364 = shalt.err (!%p361_p6)
}
 0x142   :  { %s365_s18 = scalar_lea.hbm %s474_s3, 16 }
 0x143   :  { %p366_p7 = scmp.ne.s32.totalorder %s474_s3, %s365_s18  ;;  %p369_p8 = scmp.lt.u32.totalorder %s365_s18, %s474_s3 }
 0x145   :  { %p371_p9 = pnand %p369_p8, %p366_p7 }
 0x147   :  { %374 = shalt.err (!%p371_p9)
}
 0x148   :  { %193 = dma.vmem_to_hbm [thread:$0]  %s191_s13, 16, %s474_s3, [#allocation5]  }
 0x149   :  { %379 = dma.done.wait [#allocation5], 16  }
 0x14a   :  { %380 = vsyncadd [#allocation5], 4294967280 }
 0x14b   :  { %197 = vsyncpa [#allocation4], 1 }
 0x14c   :  { %198 = vsyncpa [#allocation7], 1 }
 0x14d   :  { %199 = vsyncpa [#allocation5], 1 }

</bundles_post_ra>
